<compile_context>
chip_gen: v5e
topology: v5e:2x2
jax: 0.10.0
libtpu: 0.0.40
codegen_flags: <defaults>
</compile_context>

<pallas_src>
import math

import jax
import jax.numpy as jnp
from jax.experimental import pallas as pl
from jax.experimental.pallas import tpu as pltpu

_SQRT_2_OVER_PI = math.sqrt(2.0 / math.pi)
_GELU_A = 0.044715


def _make_gelu_kernel(compute_dtype):
    c = _SQRT_2_OVER_PI
    ca = _SQRT_2_OVER_PI * _GELU_A

    def kernel(x_ref, o_ref):
        x = x_ref[...].astype(compute_dtype)
        half_x = jnp.asarray(0.5, compute_dtype) * x
        x2 = x * x
        # C*(x + A*x^3) == x*(C + (C*A)*x^2)  -> constants folded (3 mul + 1 add)
        inner = x * (jnp.asarray(c, compute_dtype) + jnp.asarray(ca, compute_dtype) * x2)
        # 0.5*x*(1 + tanh) == half_x + half_x*tanh -> 7 VALU ops total, 1 EUP push
        o_ref[...] = (half_x + half_x * jnp.tanh(inner)).astype(o_ref.dtype)

    return kernel


def _round_up(n: int, m: int) -> int:
    return ((n + m - 1) // m) * m


def _sublane(dtype) -> int:
    """Rows per vreg sublane tile for this dtype (8 f32, 16 bf16, 32 int8/fp8)."""
    size = jnp.dtype(dtype).itemsize
    if size >= 4:
        return 8
    if size == 2:
        return 16
    return 32


def _chip_profile() -> dict:
    """Best-effort chip detection; conservative defaults when unknown."""
    kind = ""
    try:
        kind = jax.devices()[0].device_kind.lower()
    except Exception:  # pragma: no cover - defensive
        pass
    if "v7" in kind or "7x" in kind:
        # 2 TCs/chip, 64 MiB VMEM, ~3.2 TB/s: bigger blocks, even megacore split.
        return dict(cores=2, block_bytes=4 << 20, vmem_limit=32 << 20, bf16_math=True)
    if "v6" in kind:
        return dict(cores=1, block_bytes=4 << 20, vmem_limit=32 << 20, bf16_math=True)
    if "v5" in kind:
        return dict(cores=1, block_bytes=2 << 20, vmem_limit=None, bf16_math=False)
    return dict(cores=1, block_bytes=2 << 20, vmem_limit=None, bf16_math=False)


def gelu_pallas(x: jax.Array) -> jax.Array:
    """Tanh-approx GELU matching the PyTorch module's forward."""
    orig_shape = x.shape
    orig_dtype = x.dtype
    n_elems = x.size
    if n_elems == 0:
        return x

    prof = _chip_profile()
    itemsize = jnp.dtype(orig_dtype).itemsize
    sub = _sublane(orig_dtype)
    block_bytes = prof["block_bytes"]
    cores = prof["cores"]

    if orig_dtype == jnp.bfloat16 and prof["bf16_math"]:
        compute_dtype = jnp.bfloat16  # bf16 VPU/EUP keeps the kernel HBM-bound
    else:
        compute_dtype = jnp.float32

    # ---- Layout selection: always lane-dense output tiles. ----
    padded_to = None
    if x.ndim >= 2 and orig_shape[-1] >= 128:
        # Keep the minor dim, collapse leading dims (layout-preserving reshape).
        cols = orig_shape[-1]
        rows = n_elems // cols
        x2 = x.reshape(rows, cols)
    else:
        # Trailing dim < 128 (or 1-D): flatten into a lane-dense slab. One small
        # pad copy beats <128-wide blocks where every store is masked.
        flat = x.reshape(-1)
        cols = min(2048, _round_up(n_elems, 128))
        padded_to = _round_up(n_elems, cols)
        if padded_to != n_elems:
            flat = jnp.pad(flat, (0, padded_to - n_elems))
        rows = padded_to // cols
        x2 = flat.reshape(rows, cols)

    # ---- Column tiling (only needed for extremely wide rows; guards VMEM). ----
    max_cols_per_block = max(128, (block_bytes // (sub * itemsize)) // 128 * 128)
    tile_cols = cols if cols <= max_cols_per_block else max_cols_per_block

    # ---- Row tiling: ~block_bytes per block, aligned to sublane packing. ----
    row_bytes = max(1, tile_cols * itemsize)
    cand = max(sub, (block_bytes // row_bytes) // sub * sub)
    if cores >= 2 and rows > sub:
        # Keep >= 4*cores row blocks (when there is enough work) for megacore.
        cap = max(sub, _round_up(pl.cdiv(rows, 4 * cores), sub))
        cand = min(cand, cap)
    tile_rows = rows if rows <= cand else cand
    if cores >= 2 and tile_rows < rows:
        nb = pl.cdiv(rows, tile_rows)
        if nb % 2 == 1:  # best-effort even split across the two TensorCores
            tile_rows = max(sub, _round_up(pl.cdiv(rows, nb + 1), sub))

    grid = (pl.cdiv(rows, tile_rows), pl.cdiv(cols, tile_cols))

    cost = pl.CostEstimate(
        flops=7 * rows * cols,
        transcendentals=rows * cols,
        bytes_accessed=2 * rows * cols * itemsize,
    )

    cp_kwargs = dict(dimension_semantics=("parallel", "parallel"))
    if prof["vmem_limit"] is not None:
        cp_kwargs["vmem_limit_bytes"] = prof["vmem_limit"]

    out = pl.pallas_call(
        _make_gelu_kernel(compute_dtype),
        out_shape=jax.ShapeDtypeStruct((rows, cols), orig_dtype),
        grid=grid,
        in_specs=[pl.BlockSpec((tile_rows, tile_cols), lambda i, j: (i, j))],
        out_specs=pl.BlockSpec((tile_rows, tile_cols), lambda i, j: (i, j)),
        compiler_params=pltpu.CompilerParams(**cp_kwargs),
        cost_estimate=cost,
    )(x2)

    if padded_to is not None and padded_to != n_elems:
        out = out.reshape(-1)[:n_elems]
    return out.reshape(orig_shape)


def gelu_ref(x: jax.Array) -> jax.Array:
    """Pure-JAX reference mirroring the PyTorch module (f32 math)."""
    xf = x.astype(jnp.float32)
    c = jnp.float32(_SQRT_2_OVER_PI)
    return (0.5 * xf * (1.0 + jnp.tanh(c * (xf + 0.044715 * xf ** 3)))).astype(x.dtype)


if __name__ == "__main__":
    key = jax.random.PRNGKey(0)
    k1, k2, k3, k4 = jax.random.split(key, 4)

    # 1) Primary lane-dense path: trailing dim is a 128-multiple
    #    (layout-preserving collapse of leading dims, no extra HBM copies).
    x1 = jax.random.normal(k1, (2, 8, 256), dtype=jnp.float32)
    y1 = gelu_pallas(x1)
    jax.block_until_ready(y1)
    assert y1.shape == x1.shape and y1.dtype == x1.dtype
    assert jnp.allclose(y1, gelu_ref(x1), atol=1e-5, rtol=1e-5)

    # 2) Small trailing dim (<128): flattened lane-dense slab path.
    x2 = jax.random.normal(k2, (2, 8, 32), dtype=jnp.float32)
    y2 = gelu_pallas(x2)
    jax.block_until_ready(y2)
    assert y2.shape == x2.shape and y2.dtype == x2.dtype
    assert jnp.allclose(y2, gelu_ref(x2), atol=1e-5, rtol=1e-5)

    # 3) Awkward non-128-divisible element count: pad + crop fallback.
    x3 = jax.random.normal(k3, (5, 7, 9), dtype=jnp.float32)
    y3 = gelu_pallas(x3)
    jax.block_until_ready(y3)
    assert y3.shape == x3.shape and y3.dtype == x3.dtype
    assert jnp.allclose(y3, gelu_ref(x3), atol=1e-5, rtol=1e-5)

    # 4) bf16 activations (compute dtype chosen per chip; loose tolerance).
    x4 = jax.random.normal(k4, (4, 16, 256), dtype=jnp.bfloat16)
    y4 = gelu_pallas(x4)
    jax.block_until_ready(y4)
    assert y4.shape == x4.shape and y4.dtype == x4.dtype
    assert jnp.allclose(
        y4.astype(jnp.float32), gelu_ref(x4).astype(jnp.float32), atol=1e-1, rtol=5e-2
    )

    print("KERNEL_OK")
</pallas_src>

<mosaic_0001>
module attributes {stable_mosaic.version = 11 : i64} {
  func.func @kernel(%arg0: i32, %arg1: i32, %arg2: memref<16x256xf32, #tpu.memory_space<vmem>>, %arg3: memref<16x256xf32, #tpu.memory_space<vmem>>) attributes {dimension_semantics = [#tpu.dimension_semantics<parallel>, #tpu.dimension_semantics<parallel>], iteration_bounds = array<i64: 1, 1>, scalar_prefetch = 0 : i64, scratch_operands = 0 : i64, tpu.core_type = #tpu.core_type<tc>, window_params = [{transform_indices = @transform_0, window_bounds = array<i64: 16, 256>}, {transform_indices = @transform_1, window_bounds = array<i64: 16, 256>}]} {
    %c0 = arith.constant 0 : index
    %c0_0 = arith.constant 0 : index
    %0 = vector.load %arg2[%c0, %c0_0] : memref<16x256xf32, #tpu.memory_space<vmem>>, vector<16x256xf32>
    %cst = arith.constant 5.000000e-01 : f32
    %1 = vector.broadcast %cst : f32 to vector<16x256xf32>
    %2 = arith.mulf %1, %0 : vector<16x256xf32>
    %3 = arith.mulf %0, %0 : vector<16x256xf32>
    %cst_1 = arith.constant 0.0356774069 : f32
    %4 = vector.broadcast %cst_1 : f32 to vector<16x256xf32>
    %5 = arith.mulf %4, %3 : vector<16x256xf32>
    %cst_2 = arith.constant 0.797884583 : f32
    %6 = vector.broadcast %cst_2 : f32 to vector<16x256xf32>
    %7 = arith.addf %6, %5 : vector<16x256xf32>
    %8 = arith.mulf %0, %7 : vector<16x256xf32>
    %9 = math.tanh %8 : vector<16x256xf32>
    %10 = arith.mulf %2, %9 : vector<16x256xf32>
    %11 = arith.addf %2, %10 : vector<16x256xf32>
    %c0_3 = arith.constant 0 : index
    %c0_4 = arith.constant 0 : index
    %12 = vector.load %arg3[%c0_3, %c0_4] : memref<16x256xf32, #tpu.memory_space<vmem>>, vector<16x256xf32>
    tpu.vector_store %arg3[%c0_3, %c0_4], %11 {strides = array<i32>} : memref<16x256xf32, #tpu.memory_space<vmem>>, vector<16x256xf32>,
    return
  }
  func.func @transform_0(%arg0: i32, %arg1: i32) -> (i32, i32) {
    %c0_i32 = arith.constant 0 : i32
    return %arg0, %arg1 : i32, i32
  }
  func.func @transform_1(%arg0: i32, %arg1: i32) -> (i32, i32) {
    %c0_i32 = arith.constant 0 : i32
    return %arg0, %arg1 : i32, i32
  }
}

</mosaic_0001>

<bundles_post_ra>
// kernel: tpu_custom_call.1
= control target key start
LH: loop header
LB: loop body
LE: loop exit
PB: predicated region body
PF: predicated region fallthrough
CT: control target
= control target key end

     0   :  { %6 = vsyncpa [#allocation3], 0  ;;  %s174_s0 = inlined_call_operand.hbm [shape: f32[16,256], index: 0, kind: input, shape index: {}]   ;;  %s175_s1 = inlined_call_operand.hbm [shape: f32[16,256], index: 1, kind: output, shape index: {}]  }
   0x1   :  { %7 = vsyncpa [#allocation4], 0  ;;  %s12_s8 = sshll.u32 %s174_s0, 4  ;;  %s148_s9 = smov [#allocation2]   ;;  %s13_s8 = int_to_ptr.hbm [resolvable:$true] %s12_s8 }
   0x2   :  { %s14_s10 = sshll.u32 %s148_s9, 4  ;;  %s149_s11 = smov 256   ;;  %s15_s10 = int_to_ptr.vmem [resolvable:$true] %s14_s10 }
   0x3   :  { %s150_s12 = smov 16  }
   0x4   :  { %20 = dma.hbm_to_vmem [thread:$0]  %s13_s8, 512, %s15_s10, [#allocation3], %s149_s11, %s149_s11, %s150_s12  }
   0x5   :  { %144 = dma.done.wait [#allocation3], 512  }
   0x6   :  { %145 = vsyncadd [#allocation3], 4294966784  ;;  %v25_v0 = vld [vmem:[#allocation2] sm:$0xff]  ;;  %v26_v1 = vld [vmem:[#allocation2 + $0x8] sm:$0xff]  ;;  %s151_s0 = smov [#allocation5]   ;;  %s71_s16 = sshll.u32 %s175_s1, 4  ;;  %s72_s16 = int_to_ptr.hbm [resolvable:$true] %s71_s16 }
   0x7   :  { %v27_v2 = vld [vmem:[#allocation2 + $0x10] sm:$0xff]  ;;  %v33_v3 = vmul.f32 %v25_v0, %v25_v0  ;;  %v34_v4 = vmul.f32 %v26_v1, %v26_v1  ;;  %v28_v5 = vld [vmem:[#allocation2 + $0x18] sm:$0xff]  ;;  %v29_v20 = vmul.f32 0.5, %v25_v0  ;;  %v30_v21 = vmul.f32 0.5, %v26_v1  ;;  %s69_s13 = sshll.u32 %s151_s0, 4  ;;  %s70_s13 = int_to_ptr.vmem [resolvable:$true] %s69_s13 }
   0x8   :  { %v35_v6 = vmul.f32 %v27_v2, %v27_v2  ;;  %v36_v7 = vmul.f32 %v28_v5, %v28_v5  ;;  %v31_v22 = vmul.f32 0.5, %v27_v2  ;;  %v32_v24 = vmul.f32 0.5, %v28_v5 }
   0x9   :  { %v37_v8 = vmul.f32 0.035677407, %v33_v3  ;;  %v38_v9 = vmul.f32 0.035677407, %v34_v4 }
   0xa   :  { %v39_v10 = vmul.f32 0.035677407, %v35_v6  ;;  %v40_v11 = vmul.f32 0.035677407, %v36_v7 }
   0xb   :  { %v41_v12 = vadd.f32 0.7978846, %v37_v8  ;;  %v42_v13 = vadd.f32 0.7978846, %v38_v9 }
   0xc   :  { %v43_v14 = vadd.f32 0.7978846, %v39_v10  ;;  %v44_v15 = vadd.f32 0.7978846, %v40_v11 }
   0xd   :  { %v45_v16 = vmul.f32 %v41_v12, %v25_v0  ;;  %v46_v17 = vmul.f32 %v42_v13, %v26_v1 }
   0xe   :  { %v47_v18 = vmul.f32 %v43_v14, %v27_v2  ;;  %v48_v19 = vmul.f32 %v44_v15, %v28_v5 }
   0xf   :  { %88 = vtanh.f32 %v45_v16 }
  0x10   :  { %90 = vtanh.f32 %v46_v17 }
  0x11   :  { %92 = vtanh.f32 %v47_v18 }
  0x12   :  { %94 = vtanh.f32 %v48_v19 }
  0x15   :  { %v89_v23 = vpop.eup %88 }
  0x16   :  { %v91_v25 = vpop.eup %90  ;;  %v53_v26 = vmul.f32 %v89_v23, %v29_v20 }
  0x17   :  { %v93_v27 = vpop.eup %92  ;;  %v54_v28 = vmul.f32 %v91_v25, %v30_v21 }
  0x18   :  { %v95_v29 = vpop.eup %94  ;;  %v57_v30 = vadd.f32 %v53_v26, %v29_v20  ;;  %v55_v31 = vmul.f32 %v93_v27, %v31_v22 }
  0x19   :  { %v58_v32 = vadd.f32 %v54_v28, %v30_v21  ;;  %v56_v33 = vmul.f32 %v95_v29, %v32_v24 }
  0x1a   :  { %61 = vst [vmem:[#allocation5] sm:$0xff] %v57_v30  ;;  %v59_v34 = vadd.f32 %v55_v31, %v31_v22 }
  0x1b   :  { %62 = vst [vmem:[#allocation5 + $0x8] sm:$0xff] %v58_v32  ;;  %v60_v35 = vadd.f32 %v56_v33, %v32_v24 }
  0x1c   :  { %63 = vst [vmem:[#allocation5 + $0x10] sm:$0xff] %v59_v34 }
  0x1d   :  { %64 = vst [vmem:[#allocation5 + $0x18] sm:$0xff] %v60_v35 }
  0x1e   :  { %77 = dma.vmem_to_hbm [thread:$0]  %s70_s13, 512, %s72_s16, [#allocation4], %s149_s11, %s149_s11, %s150_s12  }
  0x1f   :  { %146 = dma.done.wait [#allocation4], 512  }
  0x20   :  { %147 = vsyncadd [#allocation4], 4294966784 }
  0x21   :  { %82 = vsyncpa [#allocation3], 1 }
  0x22   :  { %83 = vsyncpa [#allocation4], 1 }

</bundles_post_ra>
